<compile_context>
chip_gen: v7x
topology: tpu7x:2x2x1
jax: 0.10.0
libtpu: 0.0.40
codegen_flags: <defaults>
</compile_context>

<pallas_src>
import jax
import jax.numpy as jnp
from jax.experimental import pallas as pl
from jax.experimental.pallas import tpu as pltpu

NEG_SLOPE = 0.01      # nn.LeakyReLU default
LANE = 128            # TPU lane width
NEG_BIG = -1e30       # finite "minus infinity" for padded softmax lanes


def _round_up(x, m):
    return ((x + m - 1) // m) * m


def _leaky_relu(x):
    return jnp.where(x > 0, x, NEG_SLOPE * x)


def mlp_kernel(x_ref, w1_ref, b1_ref, w2_ref, b2_ref, w3_ref, b3_ref, o_ref):
    dot = lambda a, b: jnp.dot(a, b, preferred_element_type=jnp.float32,
                               precision=jax.lax.Precision.HIGHEST)

    # Layer 1: Linear(32 -> 128pad) + LeakyReLU   (Dropout = identity in eval)
    h = _leaky_relu(dot(x_ref[...], w1_ref[...]) + b1_ref[...])
    # Layer 2: Linear(128pad -> 128pad) + LeakyReLU
    h = _leaky_relu(dot(h, w2_ref[...]) + b2_ref[...])
    # Layer 3: Linear(128pad -> 128pad; real cols 0..15, pad bias=-1e30) + LeakyReLU
    h = _leaky_relu(dot(h, w3_ref[...]) + b3_ref[...])

    # softmax over dim=1 (feature axis).  Pad lanes sit at ~-1e28 -> exp == 0,
    # so the 128-wide softmax equals softmax over the 16 real outputs.
    m = jnp.max(h, axis=-1, keepdims=True)
    e = jnp.exp(h - m)
    s = jnp.sum(e, axis=-1, keepdims=True)
    o_ref[...] = (e / s).astype(o_ref.dtype)   # exact divide: rows sum to 1


def _prep_padded_params(params, lane=LANE):
    """Zero-pad all layers to `lane` output columns (and matching input rows).

    Padded hidden activations are exactly 0 (zero weights + zero bias), and the
    padded output lanes get bias NEG_BIG so softmax assigns them probability 0.
    Returns (padded_params, real_output_dim).
    """
    w1, b1 = params["w1"], params["b1"]   # (32, 64), (1, 64)
    w2, b2 = params["w2"], params["b2"]   # (64, 64), (1, 64)
    w3, b3 = params["w3"], params["b3"]   # (64, 16), (1, 16)
    h1, h2, out_dim = w1.shape[1], w2.shape[1], w3.shape[1]
    assert max(h1, h2, out_dim) <= lane, "padding scheme assumes widths <= 128"

    pp = {
        "w1": jnp.pad(w1, ((0, 0), (0, lane - h1))),
        "b1": jnp.pad(b1, ((0, 0), (0, lane - h1))),
        "w2": jnp.pad(w2, ((0, lane - w2.shape[0]), (0, lane - h2))),
        "b2": jnp.pad(b2, ((0, 0), (0, lane - h2))),
        "w3": jnp.pad(w3, ((0, lane - w3.shape[0]), (0, lane - out_dim))),
        "b3": jnp.pad(b3, ((0, 0), (0, lane - out_dim)),
                      constant_values=NEG_BIG),
    }
    return pp, out_dim


def mlp_forward(x, params, *, tm=1024):
    """x: (B, input_dim) f32. params: dict of (in,out) weights / (1,out) biases
    (transpose of torch's (out,in) Linear weights)."""
    B, d_in = x.shape
    pp, out_dim = _prep_padded_params(params)
    lane = pp["w3"].shape[1]

    # Tile size: multiple of 8 sublanes, no larger than the (padded) batch.
    tm = max(8, (min(tm, _round_up(B, 8)) // 8) * 8)
    B_pad = _round_up(B, tm)
    if B_pad != B:
        x = jnp.pad(x, ((0, B_pad - B), (0, 0)))
    grid = (B_pad // tm,)

    order = ("w1", "b1", "w2", "b2", "w3", "b3")
    weight_specs = [pl.BlockSpec(pp[k].shape, lambda i: (0, 0)) for k in order]
    weight_bytes = sum(int(pp[k].size) * pp[k].dtype.itemsize for k in order)

    cost = pl.CostEstimate(
        flops=2 * B_pad * (d_in * lane + lane * lane + lane * lane),
        transcendentals=B_pad * lane,
        bytes_accessed=B_pad * (d_in + lane) * 4 + weight_bytes,
    )

    out = pl.pallas_call(
        mlp_kernel,
        out_shape=jax.ShapeDtypeStruct((B_pad, lane), jnp.float32),
        grid=grid,
        in_specs=[pl.BlockSpec((tm, d_in), lambda i: (i, 0))] + weight_specs,
        out_specs=pl.BlockSpec((tm, lane), lambda i: (i, 0)),
        compiler_params=pltpu.CompilerParams(
            dimension_semantics=("parallel",)),
        cost_estimate=cost,
    )(x, pp["w1"], pp["b1"], pp["w2"], pp["b2"], pp["w3"], pp["b3"])

    # Drop batch padding and the 112 lane-padding output columns.
    return out[:B, :out_dim]


def init_params(key, input_dim, hidden_dims, output_dim):
    """Deterministic init matching the shapes implied by MLP.__init__.
    Weights stored as (in, out) = transpose of torch's (out, in)."""
    dims = [input_dim] + list(hidden_dims) + [output_dim]  # [32, 64, 64, 16]
    params = {}
    for i in range(1, len(dims)):
        fan_in, fan_out = dims[i - 1], dims[i]
        key, kw, kb = jax.random.split(key, 3)
        bound = 1.0 / jnp.sqrt(fan_in)
        params[f"w{i}"] = jax.random.uniform(
            kw, (fan_in, fan_out), jnp.float32, -bound, bound)
        params[f"b{i}"] = jax.random.uniform(
            kb, (1, fan_out), jnp.float32, -bound, bound)
    return params


def reference_forward(x, params):
    """Plain-JAX reference of the same forward pass (for a sanity check)."""
    h = x
    for i in (1, 2, 3):
        h = _leaky_relu(
            jnp.dot(h, params[f"w{i}"], precision=jax.lax.Precision.HIGHEST)
            + params[f"b{i}"])
    return jax.nn.softmax(h, axis=1)


if __name__ == "__main__":
    INPUT_DIM, HIDDEN_DIMS, OUTPUT_DIM = 32, [64, 64], 16
    BATCH = 20  # deliberately not a multiple of the tile -> exercises padding

    key = jax.random.PRNGKey(0)
    key, kx = jax.random.split(key)
    x = jax.random.normal(kx, (BATCH, INPUT_DIM), jnp.float32)
    params = init_params(key, INPUT_DIM, HIDDEN_DIMS, OUTPUT_DIM)

    # Small tile forces a multi-step grid (resident weights + pipelined x/out).
    out = mlp_forward(x, params, tm=8)
    out = jax.block_until_ready(out)

    ref = reference_forward(x, params)
    assert out.shape == (BATCH, OUTPUT_DIM)
    assert jnp.allclose(out, ref, atol=1e-3, rtol=1e-3), "mismatch vs reference"
    assert jnp.allclose(jnp.sum(out, axis=1), 1.0, atol=1e-3), "rows not normalized"

    print("KERNEL_OK")
</pallas_src>

<mosaic_0001>
module attributes {stable_mosaic.version = 11 : i64} {
  func.func @mlp_kernel(%arg0: i32, %arg1: memref<8x32xf32, #tpu.memory_space<vmem>>, %arg2: memref<32x128xf32, #tpu.memory_space<vmem>>, %arg3: memref<1x128xf32, #tpu.memory_space<vmem>>, %arg4: memref<128x128xf32, #tpu.memory_space<vmem>>, %arg5: memref<1x128xf32, #tpu.memory_space<vmem>>, %arg6: memref<128x128xf32, #tpu.memory_space<vmem>>, %arg7: memref<1x128xf32, #tpu.memory_space<vmem>>, %arg8: memref<8x128xf32, #tpu.memory_space<vmem>>) attributes {dimension_semantics = [#tpu.dimension_semantics<parallel>], iteration_bounds = array<i64: 3>, scalar_prefetch = 0 : i64, scratch_operands = 0 : i64, tpu.core_type = #tpu.core_type<tc>, window_params = [{transform_indices = @transform_0, window_bounds = array<i64: 8, 32>}, {pipeline_mode = #tpu.pipeline_mode<synchronous>, transform_indices = @transform_1, window_bounds = array<i64: 32, 128>}, {pipeline_mode = #tpu.pipeline_mode<synchronous>, transform_indices = @transform_2, window_bounds = array<i64: 1, 128>}, {pipeline_mode = #tpu.pipeline_mode<synchronous>, transform_indices = @transform_3, window_bounds = array<i64: 128, 128>}, {pipeline_mode = #tpu.pipeline_mode<synchronous>, transform_indices = @transform_4, window_bounds = array<i64: 1, 128>}, {pipeline_mode = #tpu.pipeline_mode<synchronous>, transform_indices = @transform_5, window_bounds = array<i64: 128, 128>}, {pipeline_mode = #tpu.pipeline_mode<synchronous>, transform_indices = @transform_6, window_bounds = array<i64: 1, 128>}, {transform_indices = @transform_7, window_bounds = array<i64: 8, 128>}]} {
    %c0 = arith.constant 0 : index
    %c0_0 = arith.constant 0 : index
    %0 = vector.load %arg1[%c0, %c0_0] : memref<8x32xf32, #tpu.memory_space<vmem>>, vector<8x32xf32>
    %c0_1 = arith.constant 0 : index
    %c0_2 = arith.constant 0 : index
    %1 = vector.load %arg2[%c0_1, %c0_2] : memref<32x128xf32, #tpu.memory_space<vmem>>, vector<32x128xf32>
    %cst = arith.constant dense<0.000000e+00> : vector<8x128xf32>
    %2 = tpu.matmul %0, %1, %cst {dimension_numbers = #tpu.dot_dimension_numbers<[1], [0], [0], [1], [0, 0, 1, 1], [], []>, precision = #tpu.contract_precision<fp32>} : vector<8x32xf32>, vector<32x128xf32>, vector<8x128xf32> -> vector<8x128xf32>
    %c0_3 = arith.constant 0 : index
    %c0_4 = arith.constant 0 : index
    %3 = vector.load %arg3[%c0_3, %c0_4] : memref<1x128xf32, #tpu.memory_space<vmem>>, vector<1x128xf32>
    %4 = vector.broadcast %3 : vector<1x128xf32> to vector<8x128xf32>
    %5 = arith.addf %2, %4 : vector<8x128xf32>
    %cst_5 = arith.constant 0.000000e+00 : f32
    %6 = vector.broadcast %cst_5 : f32 to vector<8x128xf32>
    %7 = arith.cmpf ogt, %5, %6 : vector<8x128xf32>
    %cst_6 = arith.constant 0.00999999977 : f32
    %8 = vector.broadcast %cst_6 : f32 to vector<8x128xf32>
    %9 = arith.mulf %8, %5 : vector<8x128xf32>
    %10 = arith.select %7, %5, %9 : vector<8x128xi1>, vector<8x128xf32>
    %c0_7 = arith.constant 0 : index
    %c0_8 = arith.constant 0 : index
    %11 = vector.load %arg4[%c0_7, %c0_8] : memref<128x128xf32, #tpu.memory_space<vmem>>, vector<128x128xf32>
    %cst_9 = arith.constant dense<0.000000e+00> : vector<8x128xf32>
    %12 = tpu.matmul %10, %11, %cst_9 {dimension_numbers = #tpu.dot_dimension_numbers<[1], [0], [0], [1], [0, 0, 1, 1], [], []>, precision = #tpu.contract_precision<fp32>} : vector<8x128xf32>, vector<128x128xf32>, vector<8x128xf32> -> vector<8x128xf32>
    %c0_10 = arith.constant 0 : index
    %c0_11 = arith.constant 0 : index
    %13 = vector.load %arg5[%c0_10, %c0_11] : memref<1x128xf32, #tpu.memory_space<vmem>>, vector<1x128xf32>
    %14 = vector.broadcast %13 : vector<1x128xf32> to vector<8x128xf32>
    %15 = arith.addf %12, %14 : vector<8x128xf32>
    %cst_12 = arith.constant 0.000000e+00 : f32
    %16 = vector.broadcast %cst_12 : f32 to vector<8x128xf32>
    %17 = arith.cmpf ogt, %15, %16 : vector<8x128xf32>
    %cst_13 = arith.constant 0.00999999977 : f32
    %18 = vector.broadcast %cst_13 : f32 to vector<8x128xf32>
    %19 = arith.mulf %18, %15 : vector<8x128xf32>
    %20 = arith.select %17, %15, %19 : vector<8x128xi1>, vector<8x128xf32>
    %c0_14 = arith.constant 0 : index
    %c0_15 = arith.constant 0 : index
    %21 = vector.load %arg6[%c0_14, %c0_15] : memref<128x128xf32, #tpu.memory_space<vmem>>, vector<128x128xf32>
    %cst_16 = arith.constant dense<0.000000e+00> : vector<8x128xf32>
    %22 = tpu.matmul %20, %21, %cst_16 {dimension_numbers = #tpu.dot_dimension_numbers<[1], [0], [0], [1], [0, 0, 1, 1], [], []>, precision = #tpu.contract_precision<fp32>} : vector<8x128xf32>, vector<128x128xf32>, vector<8x128xf32> -> vector<8x128xf32>
    %c0_17 = arith.constant 0 : index
    %c0_18 = arith.constant 0 : index
    %23 = vector.load %arg7[%c0_17, %c0_18] : memref<1x128xf32, #tpu.memory_space<vmem>>, vector<1x128xf32>
    %24 = vector.broadcast %23 : vector<1x128xf32> to vector<8x128xf32>
    %25 = arith.addf %22, %24 : vector<8x128xf32>
    %cst_19 = arith.constant 0.000000e+00 : f32
    %26 = vector.broadcast %cst_19 : f32 to vector<8x128xf32>
    %27 = arith.cmpf ogt, %25, %26 : vector<8x128xf32>
    %cst_20 = arith.constant 0.00999999977 : f32
    %28 = vector.broadcast %cst_20 : f32 to vector<8x128xf32>
    %29 = arith.mulf %28, %25 : vector<8x128xf32>
    %30 = arith.select %27, %25, %29 : vector<8x128xi1>, vector<8x128xf32>
    %cst_21 = arith.constant dense<0xFF800000> : vector<8xf32>
    %31 = vector.multi_reduction <maximumf>, %30, %cst_21 [1] : vector<8x128xf32> to vector<8xf32>
    %32 = vector.shape_cast %31 : vector<8xf32> to vector<8x1xf32>
    %33 = vector.broadcast %32 : vector<8x1xf32> to vector<8x128xf32>
    %34 = arith.subf %30, %33 : vector<8x128xf32>
    %35 = math.exp %34 : vector<8x128xf32>
    %cst_22 = arith.constant dense<0.000000e+00> : vector<8xf32>
    %36 = vector.multi_reduction <add>, %35, %cst_22 [1] : vector<8x128xf32> to vector<8xf32>
    %37 = vector.shape_cast %36 : vector<8xf32> to vector<8x1xf32>
    %38 = vector.broadcast %37 : vector<8x1xf32> to vector<8x128xf32>
    %39 = arith.divf %35, %38 : vector<8x128xf32>
    %c0_23 = arith.constant 0 : index
    %c0_24 = arith.constant 0 : index
    %40 = vector.load %arg8[%c0_23, %c0_24] : memref<8x128xf32, #tpu.memory_space<vmem>>, vector<8x128xf32>
    tpu.vector_store %arg8[%c0_23, %c0_24], %39 {strides = array<i32>} : memref<8x128xf32, #tpu.memory_space<vmem>>, vector<8x128xf32>,
    return
  }
  func.func @transform_0(%arg0: i32) -> (i32, i32) {
    %c0_i32 = arith.constant 0 : i32
    %c0_i32_0 = arith.constant 0 : i32
    return %arg0, %c0_i32 : i32, i32
  }
  func.func @transform_1(%arg0: i32) -> (i32, i32) {
    %c0_i32 = arith.constant 0 : i32
    %c0_i32_0 = arith.constant 0 : i32
    %c0_i32_1 = arith.constant 0 : i32
    return %c0_i32, %c0_i32_0 : i32, i32
  }
  func.func @transform_2(%arg0: i32) -> (i32, i32) {
    %c0_i32 = arith.constant 0 : i32
    %c0_i32_0 = arith.constant 0 : i32
    %c0_i32_1 = arith.constant 0 : i32
    return %c0_i32, %c0_i32_0 : i32, i32
  }
  func.func @transform_3(%arg0: i32) -> (i32, i32) {
    %c0_i32 = arith.constant 0 : i32
    %c0_i32_0 = arith.constant 0 : i32
    %c0_i32_1 = arith.constant 0 : i32
    return %c0_i32, %c0_i32_0 : i32, i32
  }
  func.func @transform_4(%arg0: i32) -> (i32, i32) {
    %c0_i32 = arith.constant 0 : i32
    %c0_i32_0 = arith.constant 0 : i32
    %c0_i32_1 = arith.constant 0 : i32
    return %c0_i32, %c0_i32_0 : i32, i32
  }
  func.func @transform_5(%arg0: i32) -> (i32, i32) {
    %c0_i32 = arith.constant 0 : i32
    %c0_i32_0 = arith.constant 0 : i32
    %c0_i32_1 = arith.constant 0 : i32
    return %c0_i32, %c0_i32_0 : i32, i32
  }
  func.func @transform_6(%arg0: i32) -> (i32, i32) {
    %c0_i32 = arith.constant 0 : i32
    %c0_i32_0 = arith.constant 0 : i32
    %c0_i32_1 = arith.constant 0 : i32
    return %c0_i32, %c0_i32_0 : i32, i32
  }
  func.func @transform_7(%arg0: i32) -> (i32, i32) {
    %c0_i32 = arith.constant 0 : i32
    %c0_i32_0 = arith.constant 0 : i32
    return %arg0, %c0_i32 : i32, i32
  }
}

</mosaic_0001>

<bundles_post_ra>
// kernel: tpu_custom_call.1
= control target key start
LH: loop header
LB: loop body
LE: loop exit
PB: predicated region body
PF: predicated region fallthrough
CT: control target
= control target key end

     0   :  { %12 = vsyncpa [#allocation3], 0  ;;  %s4642_s0 = inlined_call_operand.hbm [shape: f32[24,32], index: 0, kind: input, shape index: {}]   ;;  %s4643_s1 = inlined_call_operand.hbm [shape: f32[32,128], index: 1, kind: input, shape index: {}]   ;;  %s4644_s2 = inlined_call_operand.vmem [shape: f32[1,128], index: 2, kind: input, shape index: {}]   ;;  %s4645_s3 = inlined_call_operand.hbm [shape: f32[128,128], index: 3, kind: input, shape index: {}]   ;;  %s4646_s4 = inlined_call_operand.vmem [shape: f32[1,128], index: 4, kind: input, shape index: {}]   ;;  %s4647_s5 = inlined_call_operand.hbm [shape: f32[128,128], index: 5, kind: input, shape index: {}]   ;;  %s4648_s6 = inlined_call_operand.vmem [shape: f32[1,128], index: 6, kind: input, shape index: {}]   ;;  %s4649_s7 = inlined_call_operand.hbm [shape: f32[24,128], index: 7, kind: output, shape index: {}]  }
   0x1   :  { %14 = vsyncpa [#allocation3 + $0x1], 0 }
   0x2   :  { %15 = vsyncpa [#allocation6], 0 }
   0x3   :  { %16 = vsyncpa [#allocation9], 0 }
   0x4   :  { %17 = vsyncpa [#allocation4], 0 }
   0x5   :  { %19 = vsyncpa [#allocation4 + $0x1], 0  ;;  %s3722_s24 = smov 0   ;;  %s3724_s25 = smov 0  }
   0x6   :  { %s3726_s26 = smov 0   ;;  %s3728_s27 = smov 0  }
   0x7 LB: > { %s3743_s28 = sadd.s32 4294967295, %s3670_s27   ;;  %s2299_s29 = sadd.s32 4294967294, %s3670_s27   ;;  %s3670_s27 = sphi %s3728_s27, %s4737_s27   ;;  %s3666_s26 = sphi %s3726_s26, %s4736_s26   ;;  %s3662_s25 = sphi %s3724_s25, %s4735_s25   ;;  %s3658_s24 = sphi %s3722_s24, %s4734_s24  }
   0x8   : > { %p45_p0 = scmp.ne.s32.totalorder %s3662_s25, %s3658_s24  ;;  %p4650_p1 = scmp.eq.s32.totalorder %s3743_s28, 0 }
   0x9   : > { %p201_p3 = scmp.eq.s32.totalorder %s2299_s29, 2  ;;  %p2300_p5 = scmp.ge.s32.totalorder %s3670_s27, 1 }
   0xa   : > { %p3752_p4 = por %p4650_p1, %p45_p0  ;;  %p208_p7 = scmp.lt.s32.totalorder %s3670_s27, 4 }
   0xb   : > { %p3757_p6 = por %p201_p3, %p45_p0  ;;  %s3672_s10 = smov [#allocation5]  }
   0xc   : > { %s4684_s30 = scalar_select %p3752_p4, 1, 0 }
   0xd   : > { %s4685_s8 = scalar_select %p3757_p6, 1, 0 }
   0xe   : > { %p3762_p8 = pnand %p2300_p5, %p208_p7  ;;  %s220_s11 = sshll.u32 %s3672_s10, 4  ;;  %s3766_s11 = int_to_ptr.vmem [resolvable:$true] %s220_s11 }
   0xf   : > { %4686 = sst [smem:[#allocation15_spill]] %s4685_s8  ;;  %s3673_s13 = smov [#allocation7]  }
  0x10   : > { %s4687_s9 = scalar_select %p3762_p8, 1, 0 }
  0x11   : > { %p3412_p9 = pneg %p3762_p8  ;;  %s236_s14 = sshll.u32 %s3673_s13, 4  ;;  %s3776_s14 = int_to_ptr.vmem [resolvable:$true] %s236_s14 }
  0x12   : > { %s3674_s15 = smov [#allocation8]   ;;  %s3482_s19 = scalar_lea.hbm %s4643_s1, 512 }
  0x13   : > { %p3772_p10 = pnand %p3412_p9, %p4650_p1  ;;  %s3778_s16 = sshll.u32 %s3674_s15, 4  ;;  %s253_s16 = int_to_ptr.vmem [resolvable:$true] %s3778_s16 }
  0x14   : > { %p3483_p11 = scmp.ne.s32.totalorder %s4643_s1, %s3482_s19  ;;  %p3489_p3 = scmp.lt.u32.totalorder %s3482_s19, %s4643_s1 }
  0x15   : > { %p3788_p12 = pneg %p3772_p10 }
  0x17   : > { %p3485_p13 = pnand %p3788_p12, %p3483_p11 }
  0x19   : > { %p3486_p0 = pneg %p3485_p13 }
  0x1b   : > { %p3491_p5 = pnand %p3489_p3, %p3486_p0 }
  0x1d   : > { %3494 = shalt.err (!%p3491_p5)
}
  0x1e   : > { %s3495_s10 = scalar_lea.vmem %s3766_s11, 512  ;;  %p3503_p2 = scmp.lt.s32.totalorder %s3766_s11, %s3766_s11 }
  0x1f   : > { %p3496_p7 = scmp.ne.s32.totalorder %s3766_s11, %s3495_s10  ;;  %p3504_p6 = scmp.lt.s32.totalorder %s3495_s10, %s3495_s10 }
  0x21   : > { %p3498_p9 = pnand %p3496_p7, %p3788_p12  ;;  %p3505_p11 = por %p3504_p6, %p3503_p2 }
  0x23   : > { %p3499_p1 = pneg %p3498_p9 }
  0x25   : > { %p3506_p13 = pnand %p3505_p11, %p3499_p1 }
  0x27   : > { %3509 = shalt.err (!%p3506_p13)
}
  0x28   : > { %s3675_s13 = smov 128   ;;  %s3676_s15 = smov 8  }
  0x29   : > { %3415 = dma.hbm_to_vmem [thread:$0]  (!%p3772_p10), %s4643_s1, 512, %s3766_s11, [#allocation6], %s3675_s13, %s3675_s13, %s3676_s15  }
  0x2a   : > { %s3510_s21 = scalar_lea.hbm %s4645_s3, 2048 }
  0x2b   : > { %p3511_p1 = scmp.ne.s32.totalorder %s4645_s3, %s3510_s21  ;;  %p3517_p0 = scmp.lt.u32.totalorder %s3510_s21, %s4645_s3 }
  0x2d   : > { %p3513_p2 = pnand %p3511_p1, %p3788_p12 }
  0x2f   : > { %p3514_p6 = pneg %p3513_p2 }
  0x31   : > { %p3519_p3 = pnand %p3517_p0, %p3514_p6 }
  0x33   : > { %3522 = shalt.err (!%p3519_p3)
}
  0x34   : > { %s3523_s11 = scalar_lea.vmem %s3776_s14, 2048  ;;  %p3531_p11 = scmp.lt.s32.totalorder %s3776_s14, %s3776_s14 }
  0x35   : > { %p3524_p5 = scmp.ne.s32.totalorder %s3776_s14, %s3523_s11  ;;  %p3532_p13 = scmp.lt.s32.totalorder %s3523_s11, %s3523_s11 }
  0x37   : > { %p3526_p7 = pnand %p3524_p5, %p3788_p12  ;;  %p3533_p1 = por %p3532_p13, %p3531_p11 }
  0x39   : > { %p3527_p9 = pneg %p3526_p7 }
  0x3b   : > { %p3534_p2 = pnand %p3533_p1, %p3527_p9 }
  0x3d   : > { %3537 = shalt.err (!%p3534_p2)
}
  0x3e   : > { %3418 = dma.hbm_to_vmem [thread:$0]  (!%p3772_p10), %s4645_s3, 2048, %s3776_s14, [#allocation6], %s3675_s13, %s3675_s13, %s3676_s15  }
  0x3f   : > { %s3538_s20 = scalar_lea.hbm %s4647_s5, 2048 }
  0x40   : > { %p3539_p6 = scmp.ne.s32.totalorder %s4647_s5, %s3538_s20  ;;  %p3545_p5 = scmp.lt.u32.totalorder %s3538_s20, %s4647_s5 }
  0x42   : > { %p3541_p0 = pnand %p3539_p6, %p3788_p12 }
  0x44   : > { %p3542_p3 = pneg %p3541_p0 }
  0x46   : > { %p3547_p7 = pnand %p3545_p5, %p3542_p3 }
  0x48   : > { %3550 = shalt.err (!%p3547_p7)
}
  0x49   : > { %s3551_s11 = scalar_lea.vmem %s253_s16, 2048  ;;  %p3559_p1 = scmp.lt.s32.totalorder %s253_s16, %s253_s16 }
  0x4a   : > { %p3552_p9 = scmp.ne.s32.totalorder %s253_s16, %s3551_s11  ;;  %p3560_p2 = scmp.lt.s32.totalorder %s3551_s11, %s3551_s11 }
  0x4c   : > { %p3554_p11 = pnand %p3552_p9, %p3788_p12  ;;  %p3561_p4 = por %p3560_p2, %p3559_p1 }
  0x4e   : > { %p3555_p13 = pneg %p3554_p11 }
  0x50   : > { %p3562_p8 = pnand %p3561_p4, %p3555_p13 }
  0x52   : > { %3565 = shalt.err (!%p3562_p8)
}
  0x53   : > { %3421 = dma.hbm_to_vmem [thread:$0]  (!%p3772_p10), %s4647_s5, 2048, %s253_s16, [#allocation9], %s3675_s13, %s3675_s13, %s3676_s15  }
  0x54   : > { %s3861_s22 = sadd.s32 1, %s3670_s27   ;;  %s32_s17 = sadd.s32 1, %s3666_s26 }
  0x55   : > { %s29_s12 = ssub.s32 %s3670_s27, %s3861_s22  ;;  %p39_p8 = scmp.ne.s32.totalorder %s3666_s26, %s3662_s25 }
  0x56   : > { %p30_p4 = scmp.eq.s32.totalorder %s29_s12, 0  ;;  %p40_p12 = scmp.eq.s32.totalorder %s3670_s27, 0 }
  0x57   : > { %p3433_p6 = scmp.lt.s32.totalorder %s3670_s27, 3  ;;  %p4690_p3 = scmp.eq.s32.totalorder %s3743_s28, 2 }
  0x58   : > { %s3871_s18 = scalar_select %p30_p4, %s3666_s26, %s32_s17  }
  0x59   : > { %p41_p0 = por %p40_p12, %p39_p8  ;;  %p3875_p5 = por %p4690_p3, %p39_p8 }
  0x5a   : > { %s269_s20 = sand.u32 1, %s3666_s26   ;;  %s2306_s21 = sshll.u32 %s3670_s27, 7 }
  0x5b   : > { %s2305_s16 = sshll.u32 %s269_s20, 3  ;;  %s3884_s23 = scalar_lea.hbm %s4642_s0, %s2306_s21 }
  0x5c   : > { %s273_s29 = scalar_lea.vmem [#allocation2], %s2305_s16  ;;  %p3886_p10 = pnand %p3433_p6, %p41_p0 }
  0x5d   : > { %s280_s10 = sshll.u32 %s273_s29, 4  ;;  %s270_s14 = scalar_lea.sflag [#allocation3], %s269_s20  ;;  %s3890_s10 = int_to_ptr.vmem [resolvable:$true] %s280_s10 }
  0x5e   : > { %s3566_s8 = scalar_lea.hbm %s3884_s23, 128  ;;  %p3568_p9 = pneg %p3886_p10 }
  0x5f   : > { %p3567_p7 = scmp.ne.s32.totalorder %s3884_s23, %s3566_s8  ;;  %s3571_s21 = scalar_lea.hbm %s4642_s0, 384 }
  0x60   : > { %p3572_p1 = scmp.lt.u32.totalorder %s3884_s23, %s4642_s0  ;;  %p3573_p2 = scmp.lt.u32.totalorder %s3571_s21, %s3566_s8 }
  0x61   : > { %p3569_p11 = pnand %p3568_p9, %p3567_p7  ;;  %p3575_p8 = scmp.lt.u32.totalorder %s3566_s8, %s3884_s23 }
  0x62   : > { %p3574_p4 = por %p3573_p2, %p3572_p1 }
  0x63   : > { %p3570_p13 = pneg %p3569_p11 }
  0x64   : > { %p3576_p12 = por %p3575_p8, %p3574_p4 }
  0x66   : > { %p3577_p6 = pnand %p3576_p12, %p3570_p13 }
  0x68   : > { %3580 = shalt.err (!%p3577_p6)
}
  0x69   : > { %s3581_s20 = scalar_lea.vmem %s3890_s10, 128  ;;  %s3677_s15 = smov [#allocation2]  }
  0x6a   : > { %p3582_p0 = scmp.ne.s32.totalorder %s3890_s10, %s3581_s20  ;;  %s3586_s29 = sshll.u32 %s3677_s15, 4  ;;  %s3587_s29 = int_to_ptr.vmem [resolvable:$false] %s3586_s29 }
  0x6b   : > { %s3588_s12 = scalar_lea.vmem %s3587_s29, 256  ;;  %p3589_p11 = scmp.lt.s32.totalorder %s3890_s10, %s3587_s29 }
  0x6c   : > { %p3584_p3 = pnand %p3582_p0, %p3568_p9  ;;  %p3590_p1 = scmp.lt.s32.totalorder %s3588_s12, %s3581_s20 }
  0x6e   : > { %p3585_p7 = pneg %p3584_p3  ;;  %p3591_p2 = por %p3590_p1, %p3589_p11 }
  0x70   : > { %p3592_p4 = pnand %p3591_p2, %p3585_p7 }
  0x72   : > { %3595 = shalt.err (!%p3592_p4)
}
  0x73   : > { %3425 = dma.hbm_to_vmem [thread:$0]  (!%p3886_p10), %s3884_s23, 128, %s3890_s10, %s270_s14  }
  0x74   : > { %p4693_p13 = scmp.ne.s32.totalorder %s4687_s9, 0 }
  0x75   : > { %s3920_s8 = sand.u32 (!%p4693_p13), 1, %s3662_s25   ;;  %p4694_p9 = scmp.ne.s32.totalorder (!%p4693_p13), %s4684_s30, 0 }
  0x76   : > { %289 = sbr.rel (%p4693_p13) target bundleno = 1465 (0x5b9), region = 48  ;;  %s2308_s17 = sshll.u32 (!%p4693_p13), %s3920_s8, 3 }
  0x77   : > { %s292_s21 = scalar_lea.sflag (!%p4693_p13), [#allocation3], %s3920_s8  ;;  %s295_s16 = scalar_lea.vmem (!%p4693_p13), [#allocation2], %s2308_s17 }
  0x7d   : > { %3641 = dma.done.wait (%p4694_p9), %s292_s21, 128  }
  0x7e   : > { %3643 = vsyncadd (%p4694_p9), %s292_s21, 4294967168  ;;  %p4695_p10 = scmp.eq.s32.totalorder %s3743_s28, 0 }
  0x80   : > { %3645 = dma.done.wait (%p4695_p10), [#allocation6], 2560   ;;  %p4696_p8 = pmov %p4695_p10 }
  0x82   : > { %3647 = vsyncadd (%p4696_p8), [#allocation6], 4294964736  ;;  %p4697_p12 = pmov %p4696_p8 }
  0x83   : > { %p4698_p6 = pmov %p4696_p8 }
  0x84   : > { %3649 = dma.done.wait (%p4697_p12), [#allocation9], 2048  }
  0x85   : > { %3651 = vsyncadd (%p4698_p6), [#allocation9], 4294965248  ;;  %v3678_v0 = vmov 0.0|0.0   ;;  %vm3679_vm0 = vmmov 0   ;;  %v4676_v1 = vmov 0.0   ;;  %vm350_vm1 = vcmask 261120  }
  0x86   : > { %3040 = vmatprep.subr.bf16.mxu0 %v3678_v0  ;;  %2562 = vmatprep.mubr.msk.f32.mxu0 %vm3679_vm0, %v4676_v1  ;;  %v339_v2 = vld [vmem:[#allocation5] sm:$0xff]  ;;  %v340_v3 = vld [vmem:[#allocation5 + $0x8] sm:$0xff]  ;;  %v341_v4 = vld [vmem:[#allocation5 + $0x10] sm:$0xff]  ;;  %s2317_s13 = sshll.u32 %s3743_s28, 7  ;;  %s337_s20 = scalar_lea.vmem [#allocation10], %s2308_s17 }
  0x87   : > { %3076 = vmatprep.subr.bf16.mxu1 %v3678_v0  ;;  %2652 = vmatprep.mubr.msk.f32.mxu1 %vm3679_vm0, %v4676_v1  ;;  %v355_v5 = vand.u32 4294901760, %v339_v2  ;;  %v358_v6 = vand.u32 4294901760, %v340_v3  ;;  %v342_v7 = vld [vmem:[#allocation5 + $0x18] sm:$0xff]  ;;  %v361_v8 = vand.u32 4294901760, %v341_v4  ;;  %v842_v10 = vld [vmem:[#allocation7] sm:$0xff]  ;;  %v843_v13 = vld [vmem:[#allocation7 + $0x8] sm:$0xff]  ;;  %s4599_s21 = scalar_lea.hbm %s4649_s7, %s2317_s13 }
  0x88   : > { %v338_v9 = vld [vmem:[%s295_s16] sm:$0xff]  ;;  %v364_v11 = vand.u32 4294901760, %v342_v7  ;;  %v866_v14 = vand.u32 4294901760, %v842_v10  ;;  %v869_v21 = vand.u32 4294901760, %v843_v13  ;;  %v846_v37 = vld [vmem:[#allocation7 + $0x20] sm:$0xff]  ;;  %v847_v38 = vld [vmem:[#allocation7 + $0x28] sm:$0xff] }
  0x89   : > { %v352_v12 = vsel %vm350_vm1, %v338_v9, 0  ;;  %v3944_v15 = vpack.c.bf16 %v358_v6, %v355_v5  ;;  %v3946_v16 = vsub.f32 %v339_v2, %v355_v5  ;;  %v3948_v17 = vsub.f32 %v340_v3, %v358_v6  ;;  %v844_v32 = vld [vmem:[#allocation7 + $0x10] sm:$0xff]  ;;  %v845_v33 = vld [vmem:[#allocation7 + $0x18] sm:$0xff]  ;;  %s2200_s15 = sshll.u32 %s337_s20, 4  ;;  %s2187_s16 = scalar_lea.sflag [#allocation4], %s3920_s8  ;;  %s4601_s15 = int_to_ptr.vmem [resolvable:$true] %s2200_s15 }
  0x8a   : > { %v3950_v18 = vsub.f32 %v341_v4, %v361_v8  ;;  %v3952_v19 = vsub.f32 %v342_v7, %v364_v11  ;;  %v3954_v20 = vand.u32 4294901760, %v352_v12  ;;  %v3957_v22 = vpack.c.bf16 %v364_v11, %v361_v8  ;;  %v848_v42 = vld [vmem:[#allocation7 + $0x30] sm:$0xff]  ;;  %v849_v51 = vld [vmem:[#allocation7 + $0x38] sm:$0xff]  ;;  %v850_v7 = vld [vmem:[#allocation7 + $0x40] sm:$0xff]  ;;  %s3596_s30 = scalar_lea.vmem %s4601_s15, 128  ;;  %s3681_s28 = smov [#allocation10]  }
  0x8b   : > { %3042 = vmatpush3.bf16.msra.mxu0 %v3944_v15  ;;  %v436_v23 = vand.u32 4294901760, %v3946_v16  ;;  %v443_v24 = vand.u32 4294901760, %v3948_v17  ;;  %v3967_v28 = vpack.c.bf16 %v869_v21, %v866_v14  ;;  %v3983_v36 = vsub.f32 %v842_v10, %v866_v14  ;;  %v851_v8 = vld [vmem:[#allocation7 + $0x48] sm:$0xff]  ;;  %p3597_p0 = scmp.ne.s32.totalorder %s4601_s15, %s3596_s30  ;;  %s3600_s17 = sshll.u32 %s3681_s28, 4  ;;  %s3601_s17 = int_to_ptr.vmem [resolvable:$false] %s3600_s17 }
  0x8c   : > { %v450_v25 = vand.u32 4294901760, %v3950_v18  ;;  %3043 = vmatprep.subr.bf16.mxu0 %v3678_v0  ;;  %v3964_v26 = vsub.f32 %v352_v12, %v3954_v20  ;;  %v457_v27 = vand.u32 4294901760, %v3952_v19  ;;  %v3986_v41 = vsub.f32 %v843_v13, %v869_v21  ;;  %v852_v12 = vld [vmem:[#allocation7 + $0x50] sm:$0xff]  ;;  %v853_v13 = vld [vmem:[#allocation7 + $0x58] sm:$0xff]  ;;  %s3602_s9 = scalar_lea.vmem %s3601_s17, 256  ;;  %p3603_p11 = scmp.lt.s32.totalorder %s4601_s15, %s3601_s17 }
  0x8d   : > { %v437_v29 = vsub.f32 %v3946_v16, %v436_v23  ;;  %v444_v30 = vsub.f32 %v3948_v17, %v443_v24  ;;  %3078 = vmatpush3.bf16.msra.mxu1 %v3967_v28  ;;  %v872_v45 = vand.u32 4294901760, %v844_v32  ;;  %v875_v46 = vand.u32 4294901760, %v845_v33  ;;  %p3598_p3 = pnand %p3597_p0, %p3875_p5  ;;  %p3604_p1 = scmp.lt.s32.totalorder %s3602_s9, %s3596_s30 }
  0x8e   : > { %v451_v31 = vsub.f32 %v3950_v18, %v450_v25  ;;  %v425_v34 = vand.u32 4294901760, %v3964_v26  ;;  %v458_v35 = vsub.f32 %v3952_v19, %v457_v27  ;;  %3079 = vmatprep.subr.bf16.mxu1 %v3678_v0  ;;  %v878_v49 = vand.u32 4294901760, %v846_v37 }
  0x8f   : > { %3045 = vmatpush3.bf16.msra.mxu0 %v3957_v22  ;;  %v438_v39 = vand.u32 4294901760, %v437_v29  ;;  %v445_v40 = vand.u32 4294901760, %v444_v30  ;;  %v881_v50 = vand.u32 4294901760, %v847_v38  ;;  %v3991_v53 = vpack.c.bf16 %v875_v46, %v872_v45  ;;  %p3599_p7 = pneg %p3598_p3  ;;  %p3605_p2 = por %p3604_p1, %p3603_p11 }
  0x90   : > { %v426_v43 = vsub.f32 %v3964_v26, %v425_v34  ;;  %3046 = vmatprep.subr.bf16.mxu0 %v3678_v0  ;;  %v452_v44 = vand.u32 4294901760, %v451_v31  ;;  %v459_v48 = vand.u32 4294901760, %v458_v35  ;;  %v3993_v54 = vsub.f32 %v844_v32, %v872_v45 }
  0x91   : > { %v3047_v47 = vpack.c.bf16 %v445_v40, %v438_v39  ;;  %v884_v55 = vand.u32 4294901760, %v848_v42  ;;  %v3995_v56 = vsub.f32 %v845_v33, %v875_v46  ;;  %v3997_v57 = vsub.f32 %v846_v37, %v878_v49  ;;  %3081 = vmatpush3.bf16.msra.mxu1 %v3991_v53  ;;  %p3606_p4 = pnand %p3605_p2, %p3599_p7 }
  0x92   : > { %v427_v52 = vand.u32 4294901760, %v426_v43  ;;  %v3999_v58 = vsub.f32 %v847_v38, %v881_v50  ;;  %v4002_v59 = vpack.c.bf16 %v881_v50, %v878_v49  ;;  %v887_v60 = vand.u32 4294901760, %v849_v51  ;;  %3082 = vmatprep.subr.bf16.mxu1 %v3678_v0 }
  0x93   : > { %v4004_v61 = vsub.f32 %v848_v42, %v884_v55  ;;  %v3050_v62 = vpack.c.bf16 %v459_v48, %v452_v44  ;;  %v3053_v3 = vpack.c.bf16 %v3948_v17, %v3946_v16  ;;  %v3056_v4 = vpack.c.bf16 %v3952_v19, %v3950_v18  ;;  %v854_v17 = vld [vmem:[#allocation7 + $0x60] sm:$0xff]  ;;  %v855_v18 = vld [vmem:[#allocation7 + $0x68] sm:$0xff] }
  0x94   : > { %2563 = vmatmul.mubr.f32.vlgmr.msra.gmra.mrb[0].mxu0 %v427_v52  ;;  %v4010_v63 = vsub.f32 %v849_v51, %v887_v60  ;;  %v4013_v2 = vpack.c.bf16 %v887_v60, %v884_v55  ;;  %v3065_v5 = vpack.c.bf16 %v443_v24, %v436_v23  ;;  %v3068_v6 = vpack.c.bf16 %v457_v27, %v450_v25  ;;  %v857_v23 = vld [vmem:[#allocation7 + $0x78] sm:$0xff] }
  0x95   : > { %3048 = vmatpush3.bf16.msra.mxu0 %v3047_v47  ;;  %2573 = vmatprep.mubr.msk.f32.mxu0 %vm3679_vm0, %v4676_v1  ;;  %v890_v9 = vand.u32 4294901760, %v850_v7  ;;  %v893_v10 = vand.u32 4294901760, %v851_v8  ;;  %v896_v14 = vand.u32 4294901760, %v852_v12  ;;  %v902_v19 = vand.u32 4294901760, %v854_v17 }
  0x96   : > { %3049 = vmatprep.subr.bf16.mxu0 %v3678_v0  ;;  %3084 = vmatpush3.bf16.msra.mxu1 %v4002_v59  ;;  %v911_v32 = vand.u32 4294901760, %v857_v23  ;;  %v4674_v33 = vand.u32 4294901760, %v3983_v36  ;;  %v4667_v42 = vand.u32 4294901760, %v3993_v54  ;;  %v4666_v43 = vand.u32 4294901760, %v3995_v56 }
  0x97   : > { %3085 = vmatprep.subr.bf16.mxu1 %v3678_v0  ;;  %v4057_v11 = vpack.c.bf16 %v893_v10, %v890_v9  ;;  %v4067_v24 = vsub.f32 %v850_v7, %v890_v9  ;;  %v4069_v25 = vsub.f32 %v851_v8, %v893_v10  ;;  %v4076_v29 = vsub.f32 %v854_v17, %v902_v19 }
  0x98   : > { %v4087_v38 = vsub.f32 %v857_v23, %v911_v32  ;;  %v960_v39 = vsub.f32 %v3983_v36, %v4674_v33  ;;  %v974_v46 = vsub.f32 %v3993_v54, %v4667_v42  ;;  %v981_v47 = vsub.f32 %v3995_v56, %v4666_v43  ;;  %v4251_v33 = vld [vmem:[#allocation8 + $0x48] sm:$0xff] }
  0x99   : > { %3051 = vmatpush3.bf16.msra.mxu0 %v3050_v62  ;;  %v4665_v51 = vand.u32 4294901760, %v3997_v57  ;;  %v4664_v52 = vand.u32 4294901760, %v3999_v58 }
  0x9a   : > { %3052 = vmatprep.subr.bf16.mxu0 %v3678_v0  ;;  %3087 = vmatpush3.bf16.msra.mxu1 %v4013_v2  ;;  %v961_v44 = vand.u32 4294901760, %v960_v39  ;;  %v975_v49 = vand.u32 4294901760, %v974_v46  ;;  %v982_v50 = vand.u32 4294901760, %v981_v47 }
  0x9b   : > { %3088 = vmatprep.subr.bf16.mxu1 %v3678_v0  ;;  %v988_v60 = vsub.f32 %v3997_v57, %v4665_v51  ;;  %v995_v62 = vsub.f32 %v3999_v58, %v4664_v52 }
  0x9c   : > { %2574 = vmatmul.mubr.f32.vlgmr.msra.gmra.mrb[0].mxu0 %v3954_v20  ;;  %v4109_v55 = vpack.c.bf16 %v982_v50, %v975_v49 }
  0x9d   : > { %3054 = vmatpush3.bf16.msra.mxu0 %v3053_v3  ;;  %2584 = vmatprep.mubr.msk.f32.mxu0 %vm3679_vm0, %v4676_v1  ;;  %v989_v3 = vand.u32 4294901760, %v988_v60 }
  0x9e   : > { %3055 = vmatprep.subr.bf16.mxu0 %v3678_v0  ;;  %3090 = vmatpush3.bf16.msra.mxu1 %v4057_v11 }
  0x9f   : > { %3091 = vmatprep.subr.bf16.mxu1 %v3678_v0 }
  0xa1   : > { %3057 = vmatpush3.bf16.msra.mxu0 %v3056_v4  ;;  %v996_v4 = vand.u32 4294901760, %v995_v62 }
  0xa2   : > { %3058 = vmatprep.subr.bf16.mxu0 %v3678_v0 }
  0xa3   : > { %v3107_v7 = vpack.c.bf16 %v996_v4, %v989_v3  ;;  %v4654_v4 = vand.u32 4294901760, %v4087_v38 }
  0xa4   : > { %2585 = vmatmul.mubr.f32.vlgmr.msra.gmra.mrb[0].mxu0 %v3964_v26  ;;  %v4071_v26 = vsub.f32 %v852_v12, %v896_v14 }
  0xa5   : > { %3060 = vmatpush3.bf16.msra.mxu0 %v3944_v15  ;;  %2595 = vmatprep.mubr.msk.f32.mxu0 %vm3679_vm0, %v4676_v1 }
  0xa6   : > { %3061 = vmatprep.subr.bf16.mxu0 %v3678_v0 }
  0xa9   : > { %3063 = vmatpush3.bf16.msra.mxu0 %v3957_v22 }
  0xaa   : > { %3064 = vmatprep.subr.bf16.mxu0 %v3678_v0 }
  0xac   : > { %2596 = vmatmul.mubr.f32.vlgmr.msra.gmra.mrb[0].mxu0 %v425_v34  ;;  %v4672_v34 = vand.u32 4294901760, %v3986_v41 }
  0xad   : > { %3066 = vmatpush3.bf16.msra.mxu0 %v3065_v5  ;;  %2606 = vmatprep.mubr.msk.f32.mxu0 %vm3679_vm0, %v4676_v1  ;;  %v4663_v5 = vand.u32 4294901760, %v4004_v61 }
  0xae   : > { %3067 = vmatprep.subr.bf16.mxu0 %v3678_v0  ;;  %v967_v40 = vsub.f32 %v3986_v41, %v4672_v34 }
  0xaf   : > { %v1002_v8 = vsub.f32 %v4004_v61, %v4663_v5 }
  0xb0   : > { %v968_v45 = vand.u32 4294901760, %v967_v40 }
  0xb1   : > { %3069 = vmatpush3.bf16.msra.mxu0 %v3068_v6  ;;  %v4662_v6 = vand.u32 4294901760, %v4010_v63  ;;  %v1003_v10 = vand.u32 4294901760, %v1002_v8 }
  0xb2   : > { %3070 = vmatprep.subr.bf16.mxu0 %v3678_v0  ;;  %v4105_v48 = vpack.c.bf16 %v968_v45, %v961_v44  ;;  %v4657_v45 = vand.u32 4294901760, %v4076_v29 }
  0xb3   : > { %v1009_v9 = vsub.f32 %v4010_v63, %v4662_v6 }
  0xb4   : > { %2607 = vmatmul.mubr.f32.vlgmr.msra.gmra.mrb[0].mxu0 %v3954_v20  ;;  %v1044_v49 = vsub.f32 %v4076_v29, %v4657_v45 }
  0xb5   : > { %3072 = vmatpush3.bf16.msra.mxu0 %v3944_v15  ;;  %2617 = vmatprep.mubr.msk.f32.mxu0 %vm3679_vm0, %v4676_v1  ;;  %v899_v15 = vand.u32 4294901760, %v853_v13  ;;  %v1010_v12 = vand.u32 4294901760, %v1009_v9 }
  0xb6   : > { %3073 = vmatprep.subr.bf16.mxu0 %v3678_v0  ;;  %v1045_v60 = vand.u32 4294901760, %v1044_v49 }
  0xb7   : > { %v4061_v16 = vpack.c.bf16 %v899_v15, %v896_v14  ;;  %v4073_v27 = vsub.f32 %v853_v13, %v899_v15  ;;  %v4661_v13 = vand.u32 4294901760, %v4067_v24  ;;  %v4660_v14 = vand.u32 4294901760, %v4069_v25 }
  0xb8   : > { %v3110_v15 = vpack.c.bf16 %v1010_v12, %v1003_v10  ;;  %v1065_v10 = vsub.f32 %v4087_v38, %v4654_v4 }
  0xb9   : > { %3075 = vmatpush3.bf16.msra.mxu0 %v3957_v22  ;;  %3093 = vmatpush3.bf16.msra.mxu1 %v4061_v16  ;;  %v856_v22 = vld [vmem:[#allocation7 + $0x70] sm:$0xff]  ;;  %v1016_v17 = vsub.f32 %v4067_v24, %v4661_v13  ;;  %v4658_v23 = vand.u32 4294901760, %v4073_v27 }
  0xba   : > { %3244 = vmatprep.subr.bf16.mxu0 %v3678_v0  ;;  %3094 = vmatprep.subr.bf16.mxu1 %v3678_v0  ;;  %v908_v31 = vand.u32 4294901760, %v856_v22 }
  0xbb   : > { %v1037_v39 = vsub.f32 %v4073_v27, %v4658_v23 }
  0xbc   : > { %2618 = vmatmul.mubr.f32.vlgmr.msra.gmra.mrb[0].mxu0 %v3954_v20  ;;  %v905_v20 = vand.u32 4294901760, %v855_v18  ;;  %v4083_v35 = vpack.c.bf16 %v911_v32, %v908_v31  ;;  %v4085_v37 = vsub.f32 %v856_v22, %v908_v31  ;;  %v4659_v22 = vand.u32 4294901760, %v4071_v26 }
  0xbd   : > { %2897 = vmatprep.mubr.msk.f32.mxu0 %vm3679_vm0, %v4676_v1  ;;  %v1038_v44 = vand.u32 4294901760, %v1037_v39  ;;  %v3134_v39 = vpack.c.bf16 %v4010_v63, %v4004_v61 }
  0xbe   : > { %v4065_v21 = vpack.c.bf16 %v905_v20, %v902_v19  ;;  %v4078_v30 = vsub.f32 %v855_v18, %v905_v20  ;;  %v1023_v18 = vsub.f32 %v4069_v25, %v4660_v14  ;;  %v1017_v19 = vand.u32 4294901760, %v1016_v17 }
  0xbf   : > { %v1030_v32 = vsub.f32 %v4071_v26, %v4659_v22  ;;  %v4655_v3 = vand.u32 4294901760, %v4085_v37  ;;  %v1066_v17 = vand.u32 4294901760, %v1065_v10 }
  0xc0   : > { %3096 = vmatpush3.bf16.msra.mxu1 %v4065_v21  ;;  %v1024_v20 = vand.u32 4294901760, %v1023_v18  ;;  %v4656_v46 = vand.u32 4294901760, %v4078_v30 }
  0xc1   : > { %3097 = vmatprep.subr.bf16.mxu1 %v3678_v0  ;;  %v1031_v40 = vand.u32 4294901760, %v1030_v32  ;;  %v1058_v9 = vsub.f32 %v4085_v37, %v4655_v3  ;;  %v3131_v32 = vpack.c.bf16 %v3999_v58, %v3997_v57 }
  0xc2   : > { %v3113_v31 = vpack.c.bf16 %v1024_v20, %v1017_v19  ;;  %v1051_v50 = vsub.f32 %v4078_v30, %v4656_v46  ;;  %v3125_v19 = vpack.c.bf16 %v3986_v41, %v3983_v36  ;;  %v3128_v20 = vpack.c.bf16 %v3995_v56, %v3993_v54 }
  0xc3   : > { %v3116_v47 = vpack.c.bf16 %v1038_v44, %v1031_v40  ;;  %v1059_v12 = vand.u32 4294901760, %v1058_v9  ;;  %v4259_v40 = vld [vmem:[#allocation8 + $0x58] sm:$0xff] }
  0xc4   : > { %3099 = vmatpush3.bf16.msra.mxu1 %v4083_v35  ;;  %v1052_v62 = vand.u32 4294901760, %v1051_v50 }
  0xc5   : > { %3100 = vmatprep.subr.bf16.mxu1 %v3678_v0  ;;  %v3122_v18 = vpack.c.bf16 %v1066_v17, %v1059_v12 }
  0xc6   : > { %v3119_v8 = vpack.c.bf16 %v1052_v62, %v1045_v60  ;;  %v2313_v60 = vld [vmem:[%s4644_s2] ss:$0 sm:$0xff] }
 0x18f   : > { %v835_v62 = vpop.f32.mrb[0].mxu0 }
 0x190   : > { %v3364_v9 = vadd.f32 %v2313_v60, %v835_v62  ;;  %v2619_v10 = vpop.f32.mrb[1].mxu0 }
 0x191   : > { %v1516_v10 = vld [vmem:[#allocation8 + $0x38] sm:$0xff] }
 0x192   : > { %vm839_vm2 = vcmp.gt.f32.partialorder %v3364_v9, 0.0  ;;  %v840_v12 = vmul.f32 0.01, %v3364_v9 }
 0x194   : > { %v841_v17 = vsel %vm839_vm2, %v3364_v9, %v840_v12  ;;  %v1515_v9 = vld [vmem:[#allocation8 + $0x30] sm:$0xff] }
 0x195   : > { %v4176_v4 = vand.u32 4294901760, %v841_v17  ;;  %v1551_v5 = vand.u32 4294901760, %v1515_v9 }
 0x197   : > { %v4179_v3 = vsub.f32 %v841_v17, %v4176_v4 }
 0x199   : > { %v4670_v46 = vand.u32 4294901760, %v4179_v3 }
 0x19b   : > { %v949_v45 = vsub.f32 %v4179_v3, %v4670_v46  ;;  %v4245_v46 = vld [vmem:[#allocation8 + $0x40] sm:$0xff] }
 0x19c   : > { %v1557_v44 = vand.u32 4294901760, %v4245_v46 }
 0x19d   : > { %v950_v23 = vand.u32 4294901760, %v949_v45 }
 0x19f   : > { %2653 = vmatmul.mubr.f32.vlgmr.msra.gmra.mrb[0].mxu1 %v950_v23 }
 0x1a0   : > { %3102 = vmatpush3.bf16.msra.mxu1 %v4105_v48  ;;  %2687 = vmatprep.mubr.msk.f32.mxu1 %vm3679_vm0, %v4676_v1  ;;  %v1509_v48 = vld [vmem:[#allocation8] sm:$0xff] }
 0x1a1   : > { %3103 = vmatprep.subr.bf16.mxu1 %v3678_v0 }
 0x1a4   : > { %3105 = vmatpush3.bf16.msra.mxu1 %v4109_v55  ;;  %v1510_v55 = vld [vmem:[#allocation8 + $0x8] sm:$0xff] }
 0x1a5   : > { %3106 = vmatprep.subr.bf16.mxu1 %v3678_v0  ;;  %v1536_v23 = vand.u32 4294901760, %v1510_v55 }
 0x1a7   : > { %v4203_v17 = vsub.f32 %v1510_v55, %v1536_v23  ;;  %v1554_v55 = vand.u32 4294901760, %v1516_v10 }
 0x1a8   : > { %3108 = vmatpush3.bf16.msra.mxu1 %v3107_v7  ;;  %v1511_v7 = vld [vmem:[#allocation8 + $0x10] sm:$0xff] }
 0x1a9   : > { %3109 = vmatprep.subr.bf16.mxu1 %v3678_v0  ;;  %v1539_v45 = vand.u32 4294901760, %v1511_v7  ;;  %v4669_v51 = vand.u32 4294901760, %v4203_v17  ;;  %v4233_v43 = vsub.f32 %v1516_v10, %v1554_v55 }
 0x1ac   : > { %3111 = vmatpush3.bf16.msra.mxu1 %v3110_v15  ;;  %v1533_v15 = vand.u32 4294901760, %v1509_v48 }
 0x1ad   : > { %3112 = vmatprep.subr.bf16.mxu1 %v3678_v0 }
 0x1ae   : > { %v4201_v12 = vsub.f32 %v1509_v48, %v1533_v15  ;;  %v4207_v22 = vpack.c.bf16 %v1536_v23, %v1533_v15 }
 0x1b0   : > { %3114 = vmatpush3.bf16.msra.mxu1 %v3113_v31  ;;  %v1512_v31 = vld [vmem:[#allocation8 + $0x18] sm:$0xff]  ;;  %v4668_v52 = vand.u32 4294901760, %v4201_v12 }
 0x1b1   : > { %3115 = vmatprep.subr.bf16.mxu1 %v3678_v0 }
 0x1b4   : > { %3117 = vmatpush3.bf16.msra.mxu1 %v3116_v47  ;;  %v1513_v47 = vld [vmem:[#allocation8 + $0x20] sm:$0xff] }
 0x1b5   : > { %3118 = vmatprep.subr.bf16.mxu1 %v3678_v0  ;;  %v1545_v60 = vand.u32 4294901760, %v1513_v47 }
 0x1b7   : > { %v4211_v13 = vsub.f32 %v1513_v47, %v1545_v60  ;;  %v1634_v47 = vsub.f32 %v4203_v17, %v4669_v51 }
 0x1b8   : > { %3120 = vmatpush3.bf16.msra.mxu1 %v3119_v8  ;;  %v1514_v8 = vld [vmem:[#allocation8 + $0x28] sm:$0xff] }
 0x1b9   : > { %3121 = vmatprep.subr.bf16.mxu1 %v3678_v0  ;;  %v1548_v62 = vand.u32 4294901760, %v1514_v8  ;;  %v4675_v15 = vand.u32 4294901760, %v4211_v13 }
 0x1bb   : > { %v4213_v6 = vsub.f32 %v1514_v8, %v1548_v62 }
 0x1bc   : > { %3123 = vmatpush3.bf16.msra.mxu1 %v3122_v18  ;;  %v1542_v18 = vand.u32 4294901760, %v1512_v31 }
 0x1bd   : > { %3124 = vmatprep.subr.bf16.mxu1 %v3678_v0  ;;  %v4678_v23 = vand.u32 4294901760, %v4213_v6 }
 0x1be   : > { %v4209_v14 = vsub.f32 %v1512_v31, %v1542_v18  ;;  %v4222_v31 = vsub.f32 %v1515_v9, %v1551_v5  ;;  %v1655_v9 = vsub.f32 %v4211_v13, %v4675_v15  ;;  %v4256_v49 = vpack.c.bf16 %v1542_v18, %v1539_v45 }
 0x1bf   : > { %2688 = vmatmul.mubr.f32.vlgmr.msra.gmra.mrb[0].mxu1 %v4176_v4  ;;  %v4276_v18 = vpack.c.bf16 %v1548_v62, %v1545_v60 }
 0x1c0   : > { %3126 = vmatpush3.bf16.msra.mxu1 %v3125_v19  ;;  %2722 = vmatprep.mubr.msk.f32.mxu1 %vm3679_vm0, %v4676_v1  ;;  %v4205_v19 = vsub.f32 %v1511_v7, %v1539_v45  ;;  %v4673_v7 = vand.u32 4294901760, %v4209_v14  ;;  %v4680_v51 = vand.u32 4294901760, %v4222_v31  ;;  %v4254_v1 = vld [vmem:[#allocation8 + $0x50] sm:$0xff]  ;;  %v1656_v50 = vand.u32 4294901760, %v1655_v9 }
 0x1c1   : > { %3127 = vmatprep.subr.bf16.mxu1 %v3678_v0  ;;  %v4699_v9 = vpack.c.bf16 %v4069_v25, %v4067_v24 }
 0x1c2   : > { %v4671_v48 = vand.u32 4294901760, %v4205_v19  ;;  %v1648_v42 = vsub.f32 %v4209_v14, %v4673_v7  ;;  %v4679_v7 = vand.u32 4294901760, %v4233_v43 }
 0x1c4   : > { %3129 = vmatpush3.bf16.msra.mxu1 %v3128_v20  ;;  %v1627_v20 = vsub.f32 %v4201_v12, %v4668_v52  ;;  %v1641_v8 = vsub.f32 %v4205_v19, %v4671_v48  ;;  %v1662_v52 = vsub.f32 %v4213_v6, %v4678_v23  ;;  %v1635_v48 = vand.u32 4294901760, %v1634_v47 }
 0x1c5   : > { %3130 = vmatprep.subr.bf16.mxu1 %v3678_v0  ;;  %v1649_v15 = vand.u32 4294901760, %v1648_v42  ;;  %v1676_v47 = vsub.f32 %v4233_v43, %v4679_v7  ;;  %v1560_v42 = vand.u32 4294901760, %v4251_v33 }
 0x1c6   : > { %v1628_v10 = vand.u32 4294901760, %v1627_v20  ;;  %v1642_v34 = vand.u32 4294901760, %v1641_v8  ;;  %v1669_v20 = vsub.f32 %v4222_v31, %v4680_v51 }
 0x1c7   : > { %v4284_v8 = vsub.f32 %v4251_v33, %v1560_v42 }
 0x1c8   : > { %3132 = vmatpush3.bf16.msra.mxu1 %v3131_v32  ;;  %v3245_v23 = vpack.c.bf16 %v1635_v48, %v1628_v10  ;;  %v1663_v32 = vand.u32 4294901760, %v1662_v52  ;;  %v3248_v45 = vpack.c.bf16 %v1649_v15, %v1642_v34  ;;  %v4274_v52 = vsub.f32 %v4245_v46, %v1557_v44 }
 0x1c9   : > { %3133 = vmatprep.subr.bf16.mxu1 %v3678_v0  ;;  %v1563_v48 = vand.u32 4294901760, %v4254_v1  ;;  %v4681_v34 = vand.u32 4294901760, %v4259_v40  ;;  %v4682_v62 = vand.u32 4294901760, %v4284_v8  ;;  %v1677_v10 = vand.u32 4294901760, %v1676_v47 }
 0x1ca   : > { %3246 = vmatpush3.bf16.msra.mxu0 %v3245_v23  ;;  %v4683_v15 = vand.u32 4294901760, %v4274_v52 }
 0x1cb   : > { %3247 = vmatprep.subr.bf16.mxu0 %v3678_v0  ;;  %v4293_v60 = vsub.f32 %v4254_v1, %v1563_v48  ;;  %v4299_v23 = vsub.f32 %v4259_v40, %v4681_v34  ;;  %v1690_v51 = vsub.f32 %v4284_v8, %v4682_v62 }
 0x1cc   : > { %3135 = vmatpush3.bf16.msra.mxu1 %v3134_v39  ;;  %v4287_v39 = vpack.c.bf16 %v1554_v55, %v1551_v5  ;;  %v3251_v5 = vpack.c.bf16 %v1663_v32, %v1656_v50  ;;  %v1670_v55 = vand.u32 4294901760, %v1669_v20  ;;  %v1683_v7 = vsub.f32 %v4274_v52, %v4683_v15 }
 0x1cd   : > { %3136 = vmatprep.subr.bf16.mxu1 %v3678_v0  ;;  %v1696_v34 = vand.u32 4294901760, %v4293_v60  ;;  %v4700_v50 = vpack.c.bf16 %v4073_v27, %v4071_v26  ;;  %v1691_v47 = vand.u32 4294901760, %v1690_v51  ;;  %v4701_v15 = vpack.c.bf16 %v4078_v30, %v4076_v29 }
 0x1ce   : > { %3249 = vmatpush3.bf16.msra.mxu0 %v3248_v45  ;;  %v3254_v32 = vpack.c.bf16 %v1677_v10, %v1670_v55  ;;  %v1684_v20 = vand.u32 4294901760, %v1683_v7  ;;  %v4702_v55 = vpack.c.bf16 %v4087_v38, %v4085_v37 }
 0x1cf   : > { %3250 = vmatprep.subr.bf16.mxu0 %v3678_v0  ;;  %v1697_v45 = vsub.f32 %v4293_v60, %v1696_v34 }
 0x1d0   : > { %3138 = vmatpush3.bf16.msra.mxu1 %v4699_v9  ;;  %v1703_v9 = vand.u32 4294901760, %v4299_v23 }
 0x1d1   : > { %3139 = vmatprep.subr.bf16.mxu1 %v3678_v0  ;;  %v1698_v51 = vand.u32 4294901760, %v1697_v45  ;;  %v4708_v45 = vand.u32 4294901760, %v3995_v56 }
 0x1d2   : > { %3252 = vmatpush3.bf16.msra.mxu0 %v3251_v5  ;;  %v1704_v62 = vsub.f32 %v4299_v23, %v1703_v9  ;;  %v3257_v5 = vpack.c.bf16 %v1691_v47, %v1684_v20  ;;  %v4706_v20 = vand.u32 4294901760, %v4179_v3  ;;  %v4707_v47 = vand.u32 4294901760, %v3993_v54 }
 0x1d3   : > { %3253 = vmatprep.subr.bf16.mxu0 %v3678_v0  ;;  %v4712_v54 = vand.u32 4294901760, %v4010_v63  ;;  %v4718_v63 = vand.u32 4294901760, %v4078_v30 }
 0x1d4   : > { %3141 = vmatpush3.bf16.msra.mxu1 %v4700_v50  ;;  %v1705_v7 = vand.u32 4294901760, %v1704_v62  ;;  %v4704_v62 = vand.u32 4294901760, %v3983_v36  ;;  %v4705_v50 = vand.u32 4294901760, %v3986_v41  ;;  %v4709_v36 = vand.u32 4294901760, %v3997_v57 }
 0x1d5   : > { %3142 = vmatprep.subr.bf16.mxu1 %v3678_v0  ;;  %v4710_v41 = vand.u32 4294901760, %v3999_v58  ;;  %v4715_v57 = vand.u32 4294901760, %v4071_v26  ;;  %v4716_v58 = vand.u32 4294901760, %v4073_v27  ;;  %v1524_v26 = vld [vmem:[#allocation8 + $0x78] sm:$0xff] }
 0x1d6   : > { %3255 = vmatpush3.bf16.msra.mxu0 %v3254_v32  ;;  %v3260_v10 = vpack.c.bf16 %v1705_v7, %v1698_v51  ;;  %v3173_v32 = vpack.c.bf16 %v4705_v50, %v4704_v62  ;;  %v4713_v7 = vand.u32 4294901760, %v4067_v24  ;;  %v4719_v24 = vand.u32 4294901760, %v4085_v37 }
 0x1d7   : > { %3256 = vmatprep.subr.bf16.mxu0 %v3678_v0  ;;  %v3179_v51 = vpack.c.bf16 %v4710_v41, %v4709_v36  ;;  %v3188_v62 = vpack.c.bf16 %v4716_v58, %v4715_v57 }
 0x1d8   : > { %3144 = vmatpush3.bf16.msra.mxu1 %v4701_v15  ;;  %v4703_v15 = vmov 0.0  }
 0x1d9   : > { %3145 = vmatprep.subr.bf16.mxu1 %v3678_v0 }
 0x1da   : > { %3258 = vmatpush3.bf16.msra.mxu0 %v3257_v5  ;;  %v3176_v5 = vpack.c.bf16 %v4708_v45, %v4707_v47 }
 0x1db   : > { %3259 = vmatprep.subr.bf16.mxu0 %v3678_v0 }
 0x1dc   : > { %3147 = vmatpush3.bf16.msra.mxu1 %v4702_v55  ;;  %v4714_v55 = vand.u32 4294901760, %v4069_v25  ;;  %v4720_v25 = vand.u32 4294901760, %v4087_v38 }
 0x1dd   : > { %3148 = vmatprep.subr.bf16.mxu1 %v3678_v0 }
 0x1de   : > { %3261 = vmatpush3.bf16.msra.mxu0 %v3260_v10  ;;  %v3185_v10 = vpack.c.bf16 %v4714_v55, %v4713_v7 }
 0x1df   : > { %2723 = vmatmul.mubr.f32.vlgmr.msra.gmra.mrb[0].mxu1 %v4179_v3  ;;  %3262 = vmatprep.subr.bf16.mxu0 %v3678_v0  ;;  %v4711_v3 = vand.u32 4294901760, %v4004_v61  ;;  %v4717_v61 = vand.u32 4294901760, %v4076_v29 }
 0x1e0   : > { %3150 = vmatpush3.bf16.msra.mxu1 %v3967_v28  ;;  %2757 = vmatprep.mubr.msk.f32.mxu1 %vm3679_vm0, %v4703_v15 }
 0x1e1   : > { %3151 = vmatprep.subr.bf16.mxu1 %v3678_v0  ;;  %v3182_v56 = vpack.c.bf16 %v4712_v54, %v4711_v3  ;;  %v3191_v50 = vpack.c.bf16 %v4718_v63, %v4717_v61  ;;  %v4457_v54 = vpack.c.bf16 %v1560_v42, %v1557_v44  ;;  %v2314_v44 = vld [vmem:[%s4646_s4] ss:$0 sm:$0xff]  ;;  %v3269_v63 = vpack.c.bf16 %v4203_v17, %v4201_v12 }
 0x1e4   : > { %3153 = vmatpush3.bf16.msra.mxu1 %v3991_v53 }
 0x1e5   : > { %3154 = vmatprep.subr.bf16.mxu1 %v3678_v0 }
 0x1e8   : > { %3156 = vmatpush3.bf16.msra.mxu1 %v4002_v59 }
 0x1e9   : > { %3157 = vmatprep.subr.bf16.mxu1 %v3678_v0 }
 0x1ec   : > { %3159 = vmatpush3.bf16.msra.mxu1 %v4013_v2 }
 0x1ed   : > { %3160 = vmatprep.subr.bf16.mxu1 %v3678_v0 }
 0x1f0   : > { %3162 = vmatpush3.bf16.msra.mxu1 %v4057_v11 }
 0x1f1   : > { %3163 = vmatprep.subr.bf16.mxu1 %v3678_v0 }
 0x1f4   : > { %3165 = vmatpush3.bf16.msra.mxu1 %v4061_v16 }
 0x1f5   : > { %3166 = vmatprep.subr.bf16.mxu1 %v3678_v0 }
 0x1f8   : > { %3168 = vmatpush3.bf16.msra.mxu1 %v4065_v21 }
 0x1f9   : > { %3169 = vmatprep.subr.bf16.mxu1 %v3678_v0 }
 0x1fc   : > { %3171 = vmatpush3.bf16.msra.mxu1 %v4083_v35 }
 0x1fd   : > { %3172 = vmatprep.subr.bf16.mxu1 %v3678_v0 }
 0x1ff   : > { %2758 = vmatmul.mubr.f32.vlgmr.msra.gmra.mrb[0].mxu1 %v4706_v20 }
 0x200   : > { %3174 = vmatpush3.bf16.msra.mxu1 %v3173_v32  ;;  %2792 = vmatprep.mubr.msk.f32.mxu1 %vm3679_vm0, %v4703_v15  ;;  %v3194_v32 = vpack.c.bf16 %v4720_v25, %v4719_v24  ;;  %v3272_v25 = vpack.c.bf16 %v4209_v14, %v4205_v19 }
 0x201   : > { %3175 = vmatprep.subr.bf16.mxu1 %v3678_v0 }
 0x204   : > { %3177 = vmatpush3.bf16.msra.mxu1 %v3176_v5 }
 0x205   : > { %3178 = vmatprep.subr.bf16.mxu1 %v3678_v0 }
 0x208   : > { %3180 = vmatpush3.bf16.msra.mxu1 %v3179_v51 }
 0x209   : > { %3181 = vmatprep.subr.bf16.mxu1 %v3678_v0 }
 0x20c   : > { %3183 = vmatpush3.bf16.msra.mxu1 %v3182_v56 }
 0x20d   : > { %3184 = vmatprep.subr.bf16.mxu1 %v3678_v0 }
 0x210   : > { %3186 = vmatpush3.bf16.msra.mxu1 %v3185_v10  ;;  %v4721_v10 = vand.u32 4294901760, %v4259_v40 }
 0x211   : > { %3187 = vmatprep.subr.bf16.mxu1 %v3678_v0 }
 0x212   : > { %v4466_v57 = vpack.c.bf16 %v4721_v10, %v1563_v48 }
 0x214   : > { %3189 = vmatpush3.bf16.msra.mxu1 %v3188_v62 }
 0x215   : > { %3190 = vmatprep.subr.bf16.mxu1 %v3678_v0 }
 0x218   : > { %3192 = vmatpush3.bf16.msra.mxu1 %v3191_v50 }
 0x219   : > { %3193 = vmatprep.subr.bf16.mxu1 %v3678_v0 }
 0x21c   : > { %3195 = vmatpush3.bf16.msra.mxu1 %v3194_v32 }
 0x21d   : > { %3196 = vmatprep.subr.bf16.mxu1 %v3678_v0 }
 0x21f   : > { %2793 = vmatmul.mubr.f32.vlgmr.msra.gmra.mrb[0].mxu1 %v4176_v4 }
 0x220   : > { %3198 = vmatpush3.bf16.msra.mxu1 %v3967_v28  ;;  %2827 = vmatprep.mubr.msk.f32.mxu1 %vm3679_vm0, %v4703_v15  ;;  %v1521_v28 = vld [vmem:[#allocation8 + $0x60] sm:$0xff] }
 0x221   : > { %3199 = vmatprep.subr.bf16.mxu1 %v3678_v0 }
 0x224   : > { %3201 = vmatpush3.bf16.msra.mxu1 %v3991_v53  ;;  %v1522_v53 = vld [vmem:[#allocation8 + $0x68] sm:$0xff] }
 0x225   : > { %3202 = vmatprep.subr.bf16.mxu1 %v3678_v0 }
 0x228   : > { %3204 = vmatpush3.bf16.msra.mxu1 %v4002_v59  ;;  %v1569_v59 = vand.u32 4294901760, %v1521_v28 }
 0x229   : > { %3205 = vmatprep.subr.bf16.mxu1 %v3678_v0 }
 0x22c   : > { %3207 = vmatpush3.bf16.msra.mxu1 %v4013_v2  ;;  %v1572_v2 = vand.u32 4294901760, %v1522_v53 }
 0x22d   : > { %3208 = vmatprep.subr.bf16.mxu1 %v3678_v0 }
 0x22e   : > { %v4471_v33 = vpack.c.bf16 %v1572_v2, %v1569_v59 }
 0x230   : > { %3210 = vmatpush3.bf16.msra.mxu1 %v4057_v11  ;;  %v4429_v11 = vsub.f32 %v1521_v28, %v1569_v59 }
 0x231   : > { %3211 = vmatprep.subr.bf16.mxu1 %v3678_v0 }
 0x232   : > { %v1710_v27 = vand.u32 4294901760, %v4429_v11 }
 0x234   : > { %3213 = vmatpush3.bf16.msra.mxu1 %v4061_v16  ;;  %v4431_v16 = vsub.f32 %v1522_v53, %v1572_v2  ;;  %v1711_v37 = vsub.f32 %v4429_v11, %v1710_v27  ;;  %v3275_v53 = vpack.c.bf16 %v4213_v6, %v4211_v13  ;;  %v3278_v2 = vpack.c.bf16 %v4233_v43, %v4222_v31 }
 0x235   : > { %3214 = vmatprep.subr.bf16.mxu1 %v3678_v0 }
 0x236   : > { %v1717_v29 = vand.u32 4294901760, %v4431_v16  ;;  %v1712_v47 = vand.u32 4294901760, %v1711_v37  ;;  %v3287_v1 = vpack.c.bf16 %v4431_v16, %v4429_v11 }
 0x238   : > { %3216 = vmatpush3.bf16.msra.mxu1 %v4065_v21  ;;  %v1523_v21 = vld [vmem:[#allocation8 + $0x70] sm:$0xff]  ;;  %v1718_v38 = vsub.f32 %v4431_v16, %v1717_v29 }
 0x239   : > { %3217 = vmatprep.subr.bf16.mxu1 %v3678_v0  ;;  %v1575_v30 = vand.u32 4294901760, %v1523_v21 }
 0x23a   : > { %v1719_v45 = vand.u32 4294901760, %v1718_v38  ;;  %v4724_v38 = vand.u32 4294901760, %v4205_v19  ;;  %v4729_v19 = vand.u32 4294901760, %v4233_v43  ;;  %v3335_v43 = vpack.c.bf16 %v1717_v29, %v1710_v27 }
 0x23c   : > { %3219 = vmatpush3.bf16.msra.mxu1 %v4083_v35  ;;  %v1578_v35 = vand.u32 4294901760, %v1524_v26  ;;  %v3263_v41 = vpack.c.bf16 %v1719_v45, %v1712_v47  ;;  %v4725_v47 = vand.u32 4294901760, %v4209_v14 }
 0x23d   : > { %3220 = vmatprep.subr.bf16.mxu1 %v3678_v0 }
 0x23e   : > { %v4443_v20 = vsub.f32 %v1524_v26, %v1578_v35  ;;  %3264 = vmatpush3.bf16.msra.mxu0 %v3263_v41  ;;  %v4475_v46 = vpack.c.bf16 %v1578_v35, %v1575_v30  ;;  %v3284_v26 = vpack.c.bf16 %v4299_v23, %v4293_v60  ;;  %v4723_v35 = vand.u32 4294901760, %v4203_v17 }
 0x23f   : > { %2828 = vmatmul.mubr.f32.vlgmr.msra.gmra.mrb[0].mxu1 %v4176_v4  ;;  %v4441_v4 = vsub.f32 %v1523_v21, %v1575_v30  ;;  %3265 = vmatprep.subr.bf16.mxu0 %v3678_v0  ;;  %v3281_v21 = vpack.c.bf16 %v4284_v8, %v4274_v52  ;;  %v4722_v30 = vand.u32 4294901760, %v4201_v12  ;;  %v3320_v45 = vpack.c.bf16 %v4725_v47, %v4724_v38 }
 0x240   : > { %3222 = vmatpush3.bf16.msra.mxu1 %v4207_v22  ;;  %2862 = vmatprep.mubr.msk.f32.mxu1 %vm3679_vm0, %v4703_v15  ;;  %v1731_v36 = vand.u32 4294901760, %v4443_v20  ;;  %v4726_v12 = vand.u32 4294901760, %v4211_v13  ;;  %v4727_v17 = vand.u32 4294901760, %v4213_v6  ;;  %v3332_v6 = vpack.c.bf16 %v1703_v9, %v1696_v34 }
 0x241   : > { %3223 = vmatprep.subr.bf16.mxu1 %v3678_v0  ;;  %v1724_v5 = vand.u32 4294901760, %v4441_v4  ;;  %v3290_v40 = vpack.c.bf16 %v4443_v20, %v4441_v4  ;;  %v3317_v37 = vpack.c.bf16 %v4723_v35, %v4722_v30 }
 0x242   : > { %v1732_v3 = vsub.f32 %v4443_v20, %v1731_v36  ;;  %v3323_v41 = vpack.c.bf16 %v4727_v17, %v4726_v12 }
 0x243   : > { %v1725_v51 = vsub.f32 %v4441_v4, %v1724_v5  ;;  %v3338_v13 = vpack.c.bf16 %v1731_v36, %v1724_v5 }
 0x244   : > { %3225 = vmatpush3.bf16.msra.mxu1 %v4256_v49  ;;  %v1733_v7 = vand.u32 4294901760, %v1732_v3  ;;  %v4730_v3 = vand.u32 4294901760, %v4274_v52 }
 0x245   : > { %3226 = vmatprep.subr.bf16.mxu1 %v3678_v0  ;;  %v1726_v56 = vand.u32 4294901760, %v1725_v51  ;;  %v4728_v51 = vand.u32 4294901760, %v4222_v31  ;;  %v2315_v31 = vld [vmem:[%s4648_s6] ss:$0 sm:$0xff] }
 0x247   : > { %v3266_v55 = vpack.c.bf16 %v1733_v7, %v1726_v56  ;;  %v3326_v14 = vpack.c.bf16 %v4729_v19, %v4728_v51  ;;  %v4731_v56 = vand.u32 4294901760, %v4284_v8 }
 0x248   : > { %3228 = vmatpush3.bf16.msra.mxu1 %v4276_v18 }
 0x249   : > { %3229 = vmatprep.subr.bf16.mxu1 %v3678_v0  ;;  %3267 = vmatpush3.bf16.msra.mxu0 %v3266_v55  ;;  %v3329_v7 = vpack.c.bf16 %v4731_v56, %v4730_v3 }
 0x24a   : > { %3268 = vmatprep.subr.bf16.mxu0 %v3678_v0 }
 0x24c   : > { %3231 = vmatpush3.bf16.msra.mxu1 %v4287_v39 }
 0x24d   : > { %3232 = vmatprep.subr.bf16.mxu1 %v3678_v0 }
 0x250   : > { %3234 = vmatpush3.bf16.msra.mxu1 %v4457_v54 }
 0x251   : > { %3235 = vmatprep.subr.bf16.mxu1 %v3678_v0 }
 0x254   : > { %3237 = vmatpush3.bf16.msra.mxu1 %v4466_v57 }
 0x255   : > { %3238 = vmatprep.subr.bf16.mxu1 %v3678_v0 }
 0x258   : > { %3240 = vmatpush3.bf16.msra.mxu1 %v4471_v33 }
 0x259   : > { %3241 = vmatprep.subr.bf16.mxu1 %v3678_v0 }
 0x25c   : > { %3243 = vmatpush3.bf16.msra.mxu1 %v4475_v46 }
 0x312   : > { %v1502_v42 = vpop.f32.mrb[0].mxu1 }
 0x313   : > { %v3365_v48 = vadd.f32 %v2314_v44, %v1502_v42  ;;  %v2829_v58 = vpop.f32.mrb[1].mxu1 }
 0x315   : > { %vm1506_vm3 = vcmp.gt.f32.partialorder %v3365_v48, 0.0  ;;  %v1507_v62 = vmul.f32 0.01, %v3365_v48 }
 0x317   : > { %v1508_v61 = vsel %vm1506_vm3, %v3365_v48, %v1507_v62 }
 0x318   : > { %v4487_v50 = vand.u32 4294901760, %v1508_v61 }
 0x31a   : > { %v1614_v24 = vsub.f32 %v1508_v61, %v4487_v50  ;;  %2898 = vmatmul.mubr.f32.vlgmr.msra.gmra.mrb[2].mxu0 %v4487_v50 }
 0x31b   : > { %3270 = vmatpush3.bf16.msra.mxu0 %v3269_v63  ;;  %2932 = vmatprep.mubr.msk.f32.mxu0 %vm3679_vm0, %v4703_v15 }
 0x31c   : > { %3271 = vmatprep.subr.bf16.mxu0 %v3678_v0  ;;  %v1615_v32 = vand.u32 4294901760, %v1614_v24 }
 0x31e   : > { %v1616_v28 = vsub.f32 %v1614_v24, %v1615_v32 }
 0x31f   : > { %3273 = vmatpush3.bf16.msra.mxu0 %v3272_v25 }
 0x320   : > { %3274 = vmatprep.subr.bf16.mxu0 %v3678_v0  ;;  %v1617_v59 = vand.u32 4294901760, %v1616_v28 }
 0x322   : > { %2863 = vmatmul.mubr.f32.vlgmr.msra.gmra.mrb[2].mxu1 %v1617_v59 }
 0x323   : > { %3276 = vmatpush3.bf16.msra.mxu0 %v3275_v53 }
 0x324   : > { %3277 = vmatprep.subr.bf16.mxu0 %v3678_v0 }
 0x327   : > { %3279 = vmatpush3.bf16.msra.mxu0 %v3278_v2 }
 0x328   : > { %3280 = vmatprep.subr.bf16.mxu0 %v3678_v0 }
 0x32b   : > { %3282 = vmatpush3.bf16.msra.mxu0 %v3281_v21 }
 0x32c   : > { %3283 = vmatprep.subr.bf16.mxu0 %v3678_v0 }
 0x32f   : > { %3285 = vmatpush3.bf16.msra.mxu0 %v3284_v26 }
 0x330   : > { %3286 = vmatprep.subr.bf16.mxu0 %v3678_v0 }
 0x333   : > { %3288 = vmatpush3.bf16.msra.mxu0 %v3287_v1 }
 0x334   : > { %3289 = vmatprep.subr.bf16.mxu0 %v3678_v0 }
 0x337   : > { %3291 = vmatpush3.bf16.msra.mxu0 %v3290_v40 }
 0x338   : > { %3292 = vmatprep.subr.bf16.mxu0 %v3678_v0 }
 0x33a   : > { %2933 = vmatmul.mubr.f32.vlgmr.msra.gmra.mrb[2].mxu0 %v1614_v24 }
 0x33b   : > { %3294 = vmatpush3.bf16.msra.mxu0 %v4207_v22  ;;  %2967 = vmatprep.mubr.msk.f32.mxu0 %vm3679_vm0, %v4703_v15 }
 0x33c   : > { %3295 = vmatprep.subr.bf16.mxu0 %v3678_v0 }
 0x33f   : > { %3297 = vmatpush3.bf16.msra.mxu0 %v4256_v49 }
 0x340   : > { %3298 = vmatprep.subr.bf16.mxu0 %v3678_v0 }
 0x343   : > { %3300 = vmatpush3.bf16.msra.mxu0 %v4276_v18 }
 0x344   : > { %3301 = vmatprep.subr.bf16.mxu0 %v3678_v0 }
 0x347   : > { %3303 = vmatpush3.bf16.msra.mxu0 %v4287_v39 }
 0x348   : > { %3304 = vmatprep.subr.bf16.mxu0 %v3678_v0 }
 0x34b   : > { %3306 = vmatpush3.bf16.msra.mxu0 %v4457_v54 }
 0x34c   : > { %3307 = vmatprep.subr.bf16.mxu0 %v3678_v0 }
 0x34f   : > { %3309 = vmatpush3.bf16.msra.mxu0 %v4466_v57 }
 0x350   : > { %3310 = vmatprep.subr.bf16.mxu0 %v3678_v0 }
 0x353   : > { %3312 = vmatpush3.bf16.msra.mxu0 %v4471_v33 }
 0x354   : > { %3313 = vmatprep.subr.bf16.mxu0 %v3678_v0 }
 0x357   : > { %3315 = vmatpush3.bf16.msra.mxu0 %v4475_v46 }
 0x358   : > { %3316 = vmatprep.subr.bf16.mxu0 %v3678_v0 }
 0x35a   : > { %2968 = vmatmul.mubr.f32.vlgmr.msra.gmra.mrb[2].mxu0 %v1615_v32 }
 0x35b   : > { %3318 = vmatpush3.bf16.msra.mxu0 %v3317_v37  ;;  %3002 = vmatprep.mubr.msk.f32.mxu0 %vm3679_vm0, %v4703_v15 }
 0x35c   : > { %3319 = vmatprep.subr.bf16.mxu0 %v3678_v0 }
 0x35f   : > { %3321 = vmatpush3.bf16.msra.mxu0 %v3320_v45 }
 0x360   : > { %3322 = vmatprep.subr.bf16.mxu0 %v3678_v0 }
 0x363   : > { %3324 = vmatpush3.bf16.msra.mxu0 %v3323_v41 }
 0x364   : > { %3325 = vmatprep.subr.bf16.mxu0 %v3678_v0 }
 0x367   : > { %3327 = vmatpush3.bf16.msra.mxu0 %v3326_v14 }
 0x368   : > { %3328 = vmatprep.subr.bf16.mxu0 %v3678_v0 }
 0x36b   : > { %3330 = vmatpush3.bf16.msra.mxu0 %v3329_v7 }
 0x36c   : > { %3331 = vmatprep.subr.bf16.mxu0 %v3678_v0 }
 0x36f   : > { %3333 = vmatpush3.bf16.msra.mxu0 %v3332_v6 }
 0x370   : > { %3334 = vmatprep.subr.bf16.mxu0 %v3678_v0 }
 0x373   : > { %3336 = vmatpush3.bf16.msra.mxu0 %v3335_v43 }
 0x374   : > { %3337 = vmatprep.subr.bf16.mxu0 %v3678_v0 }
 0x377   : > { %3339 = vmatpush3.bf16.msra.mxu0 %v3338_v13 }
 0x378   : > { %3340 = vmatprep.subr.bf16.mxu0 %v3678_v0 }
 0x37a   : > { %3003 = vmatmul.mubr.f32.vlgmr.msra.gmra.mrb[2].mxu0 %v4487_v50 }
 0x37b   : > { %3342 = vmatpush3.bf16.msra.mxu0 %v4207_v22  ;;  %3037 = vmatprep.mubr.msk.f32.mxu0 %vm3679_vm0, %v4703_v15 }
 0x37c   : > { %3343 = vmatprep.subr.bf16.mxu0 %v3678_v0 }
 0x37f   : > { %3345 = vmatpush3.bf16.msra.mxu0 %v4256_v49 }
 0x380   : > { %3346 = vmatprep.subr.bf16.mxu0 %v3678_v0 }
 0x383   : > { %3348 = vmatpush3.bf16.msra.mxu0 %v4276_v18 }
 0x384   : > { %3349 = vmatprep.subr.bf16.mxu0 %v3678_v0 }
 0x387   : > { %3351 = vmatpush3.bf16.msra.mxu0 %v4287_v39 }
 0x388   : > { %3352 = vmatprep.subr.bf16.mxu0 %v3678_v0 }
 0x38b   : > { %3354 = vmatpush3.bf16.msra.mxu0 %v4457_v54 }
 0x38c   : > { %3355 = vmatprep.subr.bf16.mxu0 %v3678_v0 }
 0x38f   : > { %3357 = vmatpush3.bf16.msra.mxu0 %v4466_v57 }
 0x390   : > { %3358 = vmatprep.subr.bf16.mxu0 %v3678_v0 }
 0x393   : > { %3360 = vmatpush3.bf16.msra.mxu0 %v4471_v33 }
 0x394   : > { %3361 = vmatprep.subr.bf16.mxu0 %v3678_v0 }
 0x397   : > { %3363 = vmatpush3.bf16.msra.mxu0 %v4475_v46 }
 0x39a   : > { %3038 = vmatmul.mubr.f32.vlgmr.msra.gmra.mrb[2].mxu0 %v4487_v50 }
 0x3f5   : > { %v1619_v22 = vpop.f32.mrb[2].mxu1 }
 0x3f6   : > { %v2864_v49 = vpop.f32.mrb[3].mxu1  ;;  %v1620_v52 = vadd.f32 %v2315_v31, %v1619_v22 }
 0x46d   : > { %v2169_v18 = vpop.f32.mrb[2].mxu0 }
 0x46e   : > { %v3367_v8 = vadd.f32 %v2169_v18, %v1620_v52  ;;  %v3039_v34 = vpop.f32.mrb[3].mxu0 }
 0x470   : > { %vm2173_vm4 = vcmp.gt.f32.partialorder %v3367_v8, 0.0  ;;  %v2174_v39 = vmul.f32 0.01, %v3367_v8 }
 0x472   : > { %v2175_v60 = vsel %vm2173_vm4, %v3367_v8, %v2174_v39 }
 0x473   : > { %2176 = vmax.xlane.f32.xlu0 %v2175_v60 }
 0x500   : > { %v2177_v0 = vpop.xlane.xlu0 %2176 }
 0x501   : > { %v2178_v23 = vsub.f32 %v2175_v60, %v2177_v0 }
 0x503   : > { %v2179_v9 = vmul.f32 1.442695, %v2178_v23 }
 0x505   : > { %3478 = vpow2.f32 %v2179_v9 }
 0x50f   : > { %v3479_v15 = vpop.eup %3478 }
 0x510   : > { %2181 = vadd.xlane.f32.xlu0 %v3479_v15 }
 0x59d   : > { %v2182_v11 = vpop.xlane.xlu0 %2181 }
 0x59e   : > { %3480 = vrcp.f32 %v2182_v11 }
 0x5a8   : > { %v3481_v16 = vpop.eup %3480 }
 0x5a9   : > { %v2184_v27 = vmul.f32 %v3481_v16, %v3479_v15 }
 0x5ab   : > { %2185 = vst [vmem:[%s337_s20] sm:$0xff] %v2184_v27 }
 0x5ac   : > { %3609 = shalt.err (!%p3606_p4)
}
 0x5ad   : > { %s3610_s8 = scalar_lea.hbm %s4599_s21, 128  ;;  %s3614_s11 = scalar_lea.hbm %s4649_s7, 384 }
 0x5ae   : > { %p3611_p13 = scmp.ne.s32.totalorder %s4599_s21, %s3610_s8  ;;  %p3615_p8 = scmp.lt.u32.totalorder %s4599_s21, %s4649_s7 }
 0x5af   : > { %p3616_p12 = scmp.lt.u32.totalorder %s3614_s11, %s3610_s8  ;;  %p3618_p0 = scmp.lt.u32.totalorder %s3610_s8, %s4599_s21 }
 0x5b0   : > { %p3612_p9 = pnand %p3611_p13, %p3875_p5 }
 0x5b1   : > { %p3617_p6 = por %p3616_p12, %p3615_p8 }
 0x5b2   : > { %p3613_p10 = pneg %p3612_p9 }
 0x5b3   : > { %p3619_p3 = por %p3618_p0, %p3617_p6 }
 0x5b5   : > { %p3620_p7 = pnand %p3619_p3, %p3613_p10 }
 0x5b7   : > { %3623 = shalt.err (!%p3620_p7)
}
 0x5b8   : > { %3410 = dma.vmem_to_hbm [thread:$0]  (%p3875_p5), %s4601_s15, 128, %s4599_s21, %s2187_s16  }
 0x5b9 PF: > { %s4732_s20 = sld [smem:[#allocation15_spill]]  ;;  %p3437_p11 = scmp.ge.s32.totalorder %s3670_s27, 2 }
 0x5ba   : > { %s2212_s29 = sand.u32 1, %s3658_s24  }
 0x5bb   : > { %s2213_s12 = scalar_lea.sflag [#allocation4], %s2212_s29 }
 0x5bf   : > { %p4733_p1 = scmp.ne.s32.totalorder %s4732_s20, 0 }
 0x5c1   : > { %p3427_p2 = pnand %p3437_p11, %p4733_p1 }
 0x5c3   : > { %3653 = dma.done.wait (!%p3427_p2), %s2213_s12, 128  }
 0x5c4   : > { %3655 = vsyncadd (!%p3427_p2), %s2213_s12, 4294967168  ;;  %p22_p4 = scmp.ge.s32.totalorder %s3861_s22, 5   ;;  %s4734_s24 = smov %s3662_s25 }
 0x5c5   : > { %s4735_s25 = smov %s3666_s26  ;;  %s4736_s26 = smov %s3871_s18 }
 0x5c6   : > { %s4737_s27 = smov %s3861_s22  ;;  %24 = sbr.rel (!%p22_p4) target bundleno = 7 (0x7), region = 105 }
 0x5cd   :  { %2218 = vsyncpa [#allocation3], 1 }
 0x5ce   :  { %2220 = vsyncpa [#allocation3 + $0x1], 1 }
 0x5cf   :  { %2221 = vsyncpa [#allocation6], 1 }
 0x5d0   :  { %2222 = vsyncpa [#allocation9], 1 }
 0x5d1   :  { %2223 = vsyncpa [#allocation4], 1 }
 0x5d2   :  { %2225 = vsyncpa [#allocation4 + $0x1], 1 }

</bundles_post_ra>
